<compile_context>
chip_gen: v7x
topology: tpu7x:2x2x1
jax: 0.10.0
libtpu: 0.0.40
codegen_flags: <defaults>
</compile_context>

<pallas_src>
import jax
import jax.numpy as jnp
from jax.experimental import pallas as pl
from jax.experimental.pallas import tpu as pltpu


def _round_up(x, m):
    return ((x + m - 1) // m) * m


# ---------------------------------------------------------------------------
# Kernels
# ---------------------------------------------------------------------------
def _linear_tanh_kernel_k1(x_ref, w_ref, o_ref):
    # Single-K fast path: no accumulator, no pl.when branches.
    #   x_ref: [tm, Cin_p]  (original dtype; cast on the VPU under the MXU)
    #   w_ref: [Cin_p, tn]  (pre-transposed [K, N], compute dtype)
    #   o_ref: [tm, tn]
    xv = x_ref[...].astype(w_ref.dtype)
    acc = jnp.dot(xv, w_ref[...], preferred_element_type=jnp.float32)
    o_ref[...] = jnp.tanh(acc).astype(o_ref.dtype)


def _linear_tanh_kernel_acc(x_ref, w_ref, o_ref, acc_ref):
    # General path (K tiled): f32 VMEM accumulator with init / tanh finalize.
    k = pl.program_id(2)

    @pl.when(k == 0)
    def _():
        acc_ref[...] = jnp.zeros_like(acc_ref)

    acc_ref[...] += jnp.dot(x_ref[...].astype(w_ref.dtype), w_ref[...],
                            preferred_element_type=jnp.float32)

    @pl.when(k == pl.num_programs(2) - 1)
    def _():
        o_ref[...] = jnp.tanh(acc_ref[...]).astype(o_ref.dtype)


# ---------------------------------------------------------------------------
# Wrapper
# ---------------------------------------------------------------------------
def prepare_weight(weight, compute_dtype=jnp.bfloat16):
    """One-time weight preparation (cache the result across calls).

    PyTorch layout [Cout, Cin] -> MXU-canonical [Cin_p, Cout_p] in
    `compute_dtype`, zero-padded to 128 multiples so the kernel never
    transposes and output stores are lane-dense.
    """
    Cout, Cin = weight.shape
    Cin_p = _round_up(Cin, 128)
    Cout_p = _round_up(Cout, 128)
    w = weight
    if (Cout_p, Cin_p) != (Cout, Cin):
        w = jnp.pad(w, ((0, Cout_p - Cout), (0, Cin_p - Cin)))
    return jnp.asarray(w.T, dtype=compute_dtype)


_TK_SINGLE_MAX = 2048          # K stays a single tile up to this width
_TM_CANDIDATES = (512, 256, 128)


def linear_block_forward(x, weight, *, skip_connection=None,
                         compute_dtype=jnp.bfloat16, out_dtype=None,
                         prepared_weight=None):
    """Forward pass of LinearBlock with module defaults:
         y = tanh(x @ W^T)        (bias=False, batch_norm=False, dropout=None)

    x:      [B, Cin]
    weight: [Cout, Cin]  (PyTorch nn.Linear layout)
    prepared_weight: optional output of prepare_weight(weight, compute_dtype);
                     pass it to skip the per-call pad/transpose/cast.
    """
    B, Cin = x.shape
    Cout, Cin_w = weight.shape
    assert Cin_w == Cin, "weight must be [Cout, Cin] (PyTorch layout)"
    out_dtype = x.dtype if out_dtype is None else out_dtype

    wp = (prepared_weight if prepared_weight is not None
          else prepare_weight(weight, compute_dtype))
    Cin_p, Cout_p = wp.shape
    compute_dtype = wp.dtype

    # ---- M tile: minimize padding waste; sublane-align (16 rows for 16-bit
    # ---- compute dtype, 8 otherwise).
    sub = 16 if jnp.dtype(compute_dtype).itemsize < 4 else 8
    if B <= 128:
        tm = _round_up(B, sub)
        B_p = tm
    else:
        tm, B_p = None, None
        for cand in _TM_CANDIDATES:
            bp = _round_up(B, cand)
            if B_p is None or bp < B_p:
                tm, B_p = cand, bp
    m_tiles = B_p // tm

    # ---- N tile: lane-dense 128-multiple; prefer 256/512 (v6e/v7x MXU width).
    tn = 128
    for cand in (512, 256, 128):
        if Cout_p % cand == 0:
            tn = cand
            break
    # Megacore (v7x, 2 TCs): keep >= 2 parallel grid iterations when possible.
    while m_tiles * (Cout_p // tn) < 2 and tn > 128:
        tn //= 2
    n_tiles = Cout_p // tn

    # ---- K tile: single tile whenever it fits (W read from HBM exactly once,
    # ---- no accumulator traffic); otherwise the largest 128-mult divisor.
    if Cin_p <= _TK_SINGLE_MAX:
        tk = Cin_p
    else:
        tk = 128
        for cand in (2048, 1024, 512, 256):
            if Cin_p % cand == 0:
                tk = cand
                break
    k_tiles = Cin_p // tk

    # ---- pad x (no-op when already aligned); dtype cast happens in-kernel.
    xp = x
    if (B_p, Cin_p) != (B, Cin):
        xp = jnp.pad(x, ((0, B_p - B), (0, Cin_p - Cin)))

    # ---- VMEM budget (double-buffered tiles + accumulator) -> explicit limit.
    x_item = jnp.dtype(xp.dtype).itemsize
    w_item = jnp.dtype(compute_dtype).itemsize
    o_item = jnp.dtype(out_dtype).itemsize
    ws = (2 * tm * tk * x_item + 2 * tk * tn * w_item + 2 * tm * tn * o_item
          + (tm * tn * 4 if k_tiles > 1 else 0))
    vmem_limit = int(min(max(2 * ws + (4 << 20), 24 << 20), 48 << 20))

    cost = pl.CostEstimate(
        flops=2 * B_p * Cin_p * Cout_p,
        transcendentals=B_p * Cout_p,
        bytes_accessed=(B_p * Cin_p * x_item + Cout_p * Cin_p * w_item
                        + B_p * Cout_p * o_item),
    )

    if k_tiles == 1:
        # Fast path: W block index constant across the M sweep -> W read once.
        y_p = pl.pallas_call(
            _linear_tanh_kernel_k1,
            out_shape=jax.ShapeDtypeStruct((B_p, Cout_p), out_dtype),
            grid=(n_tiles, m_tiles),
            in_specs=[
                pl.BlockSpec((tm, tk), lambda j, i: (i, 0)),   # x
                pl.BlockSpec((tk, tn), lambda j, i: (0, j)),   # W^T  [K, N]
            ],
            out_specs=pl.BlockSpec((tm, tn), lambda j, i: (i, j)),
            compiler_params=pltpu.CompilerParams(
                dimension_semantics=("parallel", "parallel"),
                vmem_limit_bytes=vmem_limit,
            ),
            cost_estimate=cost,
        )(xp, wp)
    else:
        y_p = pl.pallas_call(
            _linear_tanh_kernel_acc,
            out_shape=jax.ShapeDtypeStruct((B_p, Cout_p), out_dtype),
            grid=(n_tiles, m_tiles, k_tiles),
            in_specs=[
                pl.BlockSpec((tm, tk), lambda j, i, k: (i, k)),   # x
                pl.BlockSpec((tk, tn), lambda j, i, k: (k, j)),   # W^T [K, N]
            ],
            out_specs=pl.BlockSpec((tm, tn), lambda j, i, k: (i, j)),
            scratch_shapes=[pltpu.VMEM((tm, tn), jnp.float32)],
            compiler_params=pltpu.CompilerParams(
                dimension_semantics=("parallel", "parallel", "arbitrary"),
                vmem_limit_bytes=vmem_limit,
            ),
            cost_estimate=cost,
        )(xp, wp)

    y = y_p[:B, :Cout]

    if skip_connection == "concat":
        # TODO(synk): fuse the concat skip into the kernel (write x and
        # tanh(xW^T) into one [B, Cin+Cout] buffer) to save an HBM round-trip.
        y = jnp.concatenate([x, y.astype(x.dtype)], axis=1)
    return y


# ---------------------------------------------------------------------------
# Self-test
# ---------------------------------------------------------------------------
if __name__ == "__main__":
    key = jax.random.PRNGKey(0)
    kx, kw = jax.random.split(key)

    batch = 8
    in_channels = 32
    out_channels = 32

    x = jax.random.normal(kx, (batch, in_channels), dtype=jnp.float32)
    # Deterministic init mimicking nn.Linear's uniform(-1/sqrt(fan_in), 1/sqrt(fan_in))
    bound = 1.0 / (in_channels ** 0.5)
    weight = jax.random.uniform(
        kw, (out_channels, in_channels), dtype=jnp.float32,
        minval=-bound, maxval=bound,
    )

    ref = jnp.tanh(x @ weight.T)

    # Exact-tolerance check with f32 compute.
    out_f32 = jax.block_until_ready(
        linear_block_forward(x, weight, compute_dtype=jnp.float32))
    assert out_f32.shape == (batch, out_channels)
    assert jnp.allclose(out_f32, ref, atol=1e-5), "f32 path mismatch vs reference"

    # Default perf path: bf16 operands, f32 accumulation, cached prepared weight.
    w_prep = prepare_weight(weight, jnp.bfloat16)
    out_bf16 = jax.block_until_ready(
        linear_block_forward(x, weight, prepared_weight=w_prep))
    assert out_bf16.shape == (batch, out_channels)
    assert jnp.allclose(out_bf16, ref, atol=3e-2), "bf16 path mismatch vs reference"

    # Optional 'concat' skip connection.
    out_cat = jax.block_until_ready(
        linear_block_forward(x, weight, skip_connection="concat",
                             compute_dtype=jnp.float32))
    assert out_cat.shape == (batch, in_channels + out_channels)
    assert jnp.allclose(out_cat[:, :in_channels], x)
    assert jnp.allclose(out_cat[:, in_channels:], ref, atol=1e-5)

    print("KERNEL_OK")
</pallas_src>

<mosaic_0001>
module attributes {stable_mosaic.version = 11 : i64} {
  func.func @_linear_tanh_kernel_k1(%arg0: i32, %arg1: i32, %arg2: memref<8x128xf32, #tpu.memory_space<vmem>>, %arg3: memref<128x128xf32, #tpu.memory_space<vmem>>, %arg4: memref<8x128xf32, #tpu.memory_space<vmem>>) attributes {dimension_semantics = [#tpu.dimension_semantics<parallel>, #tpu.dimension_semantics<parallel>], iteration_bounds = array<i64: 1, 1>, scalar_prefetch = 0 : i64, scratch_operands = 0 : i64, tpu.core_type = #tpu.core_type<tc>, window_params = [{transform_indices = @transform_0, window_bounds = array<i64: 8, 128>}, {transform_indices = @transform_1, window_bounds = array<i64: 128, 128>}, {transform_indices = @transform_2, window_bounds = array<i64: 8, 128>}]} {
    %c0 = arith.constant 0 : index
    %c0_0 = arith.constant 0 : index
    %0 = vector.load %arg2[%c0, %c0_0] : memref<8x128xf32, #tpu.memory_space<vmem>>, vector<8x128xf32>
    %c0_1 = arith.constant 0 : index
    %c0_2 = arith.constant 0 : index
    %1 = vector.load %arg3[%c0_1, %c0_2] : memref<128x128xf32, #tpu.memory_space<vmem>>, vector<128x128xf32>
    %cst = arith.constant dense<0.000000e+00> : vector<8x128xf32>
    %2 = tpu.matmul %0, %1, %cst {dimension_numbers = #tpu.dot_dimension_numbers<[1], [0], [0], [1], [0, 0, 1, 1], [], []>} : vector<8x128xf32>, vector<128x128xf32>, vector<8x128xf32> -> vector<8x128xf32>
    %3 = math.tanh %2 : vector<8x128xf32>
    %c0_3 = arith.constant 0 : index
    %c0_4 = arith.constant 0 : index
    %4 = vector.load %arg4[%c0_3, %c0_4] : memref<8x128xf32, #tpu.memory_space<vmem>>, vector<8x128xf32>
    tpu.vector_store %arg4[%c0_3, %c0_4], %3 {strides = array<i32>} : memref<8x128xf32, #tpu.memory_space<vmem>>, vector<8x128xf32>,
    return
  }
  func.func @transform_0(%arg0: i32, %arg1: i32) -> (i32, i32) {
    %c0_i32 = arith.constant 0 : i32
    %c0_i32_0 = arith.constant 0 : i32
    return %arg1, %c0_i32 : i32, i32
  }
  func.func @transform_1(%arg0: i32, %arg1: i32) -> (i32, i32) {
    %c0_i32 = arith.constant 0 : i32
    %c0_i32_0 = arith.constant 0 : i32
    return %c0_i32, %arg0 : i32, i32
  }
  func.func @transform_2(%arg0: i32, %arg1: i32) -> (i32, i32) {
    %c0_i32 = arith.constant 0 : i32
    return %arg1, %arg0 : i32, i32
  }
}

</mosaic_0001>

<bundles_post_ra>
// kernel: tpu_custom_call.1
= control target key start
LH: loop header
LB: loop body
LE: loop exit
PB: predicated region body
PF: predicated region fallthrough
CT: control target
= control target key end

     0   :  { %7 = vsyncpa [#allocation3], 0  ;;  %s367_s0 = inlined_call_operand.hbm [shape: f32[8,128], index: 0, kind: input, shape index: {}]   ;;  %s368_s1 = inlined_call_operand.hbm [shape: f32[128,128], index: 1, kind: input, shape index: {}]   ;;  %s369_s2 = inlined_call_operand.hbm [shape: f32[8,128], index: 2, kind: output, shape index: {}]  }
   0x1   :  { %8 = vsyncpa [#allocation6], 0 }
   0x2   :  { %9 = vsyncpa [#allocation4], 0  ;;  %s301_s9 = smov [#allocation2]   ;;  %s302_s11 = smov [#allocation5]  }
   0x3   :  { %s16_s10 = sshll.u32 %s301_s9, 4  ;;  %s25_s12 = sshll.u32 %s302_s11, 4  ;;  %s17_s10 = int_to_ptr.vmem [resolvable:$true] %s16_s10  ;;  %s324_s12 = int_to_ptr.vmem [resolvable:$true] %s25_s12 }
   0x4   :  { %s229_s15 = scalar_lea.hbm %s367_s0, 128 }
   0x5   :  { %p230_p0 = scmp.ne.s32.totalorder %s367_s0, %s229_s15  ;;  %p233_p1 = scmp.lt.u32.totalorder %s229_s15, %s367_s0 }
   0x7   :  { %p235_p2 = pnand %p233_p1, %p230_p0 }
   0x9   :  { %238 = shalt.err (!%p235_p2)
}
   0xa   :  { %s239_s20 = scalar_lea.vmem %s17_s10, 128  ;;  %p244_p4 = scmp.lt.s32.totalorder %s17_s10, %s17_s10 }
   0xb   :  { %p240_p3 = scmp.ne.s32.totalorder %s17_s10, %s239_s20  ;;  %p245_p5 = scmp.lt.s32.totalorder %s239_s20, %s239_s20 }
   0xd   :  { %p246_p6 = por %p245_p5, %p244_p4 }
   0xf   :  { %p247_p7 = pnand %p246_p6, %p240_p3 }
  0x11   :  { %250 = shalt.err (!%p247_p7)
}
  0x12   :  { %19 = dma.hbm_to_vmem [thread:$0]  %s367_s0, 128, %s17_s10, [#allocation3]  }
  0x13   :  { %s251_s25 = scalar_lea.hbm %s368_s1, 2048 }
  0x14   :  { %p252_p8 = scmp.ne.s32.totalorder %s368_s1, %s251_s25  ;;  %p255_p9 = scmp.lt.u32.totalorder %s251_s25, %s368_s1 }
  0x16   :  { %p257_p10 = pnand %p255_p9, %p252_p8 }
  0x18   :  { %260 = shalt.err (!%p257_p10)
}
  0x19   :  { %s261_s30 = scalar_lea.vmem %s324_s12, 2048  ;;  %p266_p12 = scmp.lt.s32.totalorder %s324_s12, %s324_s12 }
  0x1a   :  { %p262_p11 = scmp.ne.s32.totalorder %s324_s12, %s261_s30  ;;  %p267_p13 = scmp.lt.s32.totalorder %s261_s30, %s261_s30 }
  0x1c   :  { %p268_p0 = por %p267_p13, %p266_p12 }
  0x1e   :  { %p269_p1 = pnand %p268_p0, %p262_p11 }
  0x20   :  { %272 = shalt.err (!%p269_p1)
}
  0x21   :  { %s303_s0 = smov 128   ;;  %s304_s3 = smov 8  }
  0x22   :  { %31 = dma.hbm_to_vmem [thread:$0]  %s368_s1, 2048, %s324_s12, [#allocation6], %s303_s0, %s303_s0, %s304_s3  }
  0x23   :  { %295 = dma.done.wait [#allocation3], 128  }
  0x24   :  { %296 = vsyncadd [#allocation3], 4294967168 }
  0x25   :  { %297 = dma.done.wait [#allocation6], 2048  }
  0x26   :  { %298 = vsyncadd [#allocation6], 4294965248  ;;  %v305_v0 = vmov 0.0|0.0   ;;  %vm306_vm0 = vmmov 0   ;;  %v307_v1 = vmov 0.0   ;;  %v39_v2 = vld [vmem:[#allocation5] sm:$0xff] }
  0x27   :  { %195 = vmatprep.subr.bf16.mxu0 %v305_v0  ;;  %192 = vmatprep.mubr.msk.f32.mxu0 %vm306_vm0, %v307_v1  ;;  %v40_v3 = vld [vmem:[#allocation5 + $0x8] sm:$0xff]  ;;  %v41_v4 = vld [vmem:[#allocation5 + $0x10] sm:$0xff]  ;;  %v42_v6 = vld [vmem:[#allocation5 + $0x18] sm:$0xff]  ;;  %s308_s1 = smov [#allocation7]  }
  0x28   :  { %v196_v5 = vpack.c.bf16 %v40_v3, %v39_v2  ;;  %v199_v7 = vpack.c.bf16 %v42_v6, %v41_v4  ;;  %v43_v8 = vld [vmem:[#allocation5 + $0x20] sm:$0xff]  ;;  %v44_v9 = vld [vmem:[#allocation5 + $0x28] sm:$0xff]  ;;  %v45_v11 = vld [vmem:[#allocation5 + $0x30] sm:$0xff]  ;;  %s133_s6 = sshll.u32 %s308_s1, 4  ;;  %s134_s6 = int_to_ptr.vmem [resolvable:$true] %s133_s6 }
  0x29   :  { %v202_v10 = vpack.c.bf16 %v44_v9, %v43_v8  ;;  %v46_v12 = vld [vmem:[#allocation5 + $0x38] sm:$0xff]  ;;  %v47_v14 = vld [vmem:[#allocation5 + $0x40] sm:$0xff]  ;;  %v48_v15 = vld [vmem:[#allocation5 + $0x48] sm:$0xff]  ;;  %s273_s7 = scalar_lea.vmem %s134_s6, 128  ;;  %p278_p3 = scmp.lt.s32.totalorder %s134_s6, %s134_s6 }
  0x2a   :  { %197 = vmatpush3.bf16.msra.mxu0 %v196_v5  ;;  %v205_v13 = vpack.c.bf16 %v46_v12, %v45_v11  ;;  %v208_v16 = vpack.c.bf16 %v48_v15, %v47_v14  ;;  %v49_v17 = vld [vmem:[#allocation5 + $0x50] sm:$0xff]  ;;  %v50_v18 = vld [vmem:[#allocation5 + $0x58] sm:$0xff]  ;;  %v51_v20 = vld [vmem:[#allocation5 + $0x60] sm:$0xff]  ;;  %p274_p2 = scmp.ne.s32.totalorder %s134_s6, %s273_s7  ;;  %p279_p4 = scmp.lt.s32.totalorder %s273_s7, %s273_s7 }
  0x2b   :  { %198 = vmatprep.subr.bf16.mxu0 %v305_v0  ;;  %v211_v19 = vpack.c.bf16 %v50_v18, %v49_v17  ;;  %v52_v21 = vld [vmem:[#allocation5 + $0x68] sm:$0xff]  ;;  %v53_v23 = vld [vmem:[#allocation5 + $0x70] sm:$0xff]  ;;  %v54_v24 = vld [vmem:[#allocation5 + $0x78] sm:$0xff] }
  0x2c   :  { %v214_v22 = vpack.c.bf16 %v52_v21, %v51_v20  ;;  %v217_v25 = vpack.c.bf16 %v54_v24, %v53_v23  ;;  %v38_v26 = vld [vmem:[#allocation2] sm:$0xff]  ;;  %p280_p5 = por %p279_p4, %p278_p3 }
  0x2e   :  { %200 = vmatpush3.bf16.msra.mxu0 %v199_v7  ;;  %p281_p6 = pnand %p280_p5, %p274_p2 }
  0x2f   :  { %201 = vmatprep.subr.bf16.mxu0 %v305_v0 }
  0x32   :  { %203 = vmatpush3.bf16.msra.mxu0 %v202_v10 }
  0x33   :  { %204 = vmatprep.subr.bf16.mxu0 %v305_v0 }
  0x36   :  { %206 = vmatpush3.bf16.msra.mxu0 %v205_v13 }
  0x37   :  { %207 = vmatprep.subr.bf16.mxu0 %v305_v0 }
  0x3a   :  { %209 = vmatpush3.bf16.msra.mxu0 %v208_v16 }
  0x3b   :  { %210 = vmatprep.subr.bf16.mxu0 %v305_v0 }
  0x3e   :  { %212 = vmatpush3.bf16.msra.mxu0 %v211_v19 }
  0x3f   :  { %213 = vmatprep.subr.bf16.mxu0 %v305_v0 }
  0x42   :  { %215 = vmatpush3.bf16.msra.mxu0 %v214_v22 }
  0x43   :  { %216 = vmatprep.subr.bf16.mxu0 %v305_v0 }
  0x46   :  { %218 = vmatpush3.bf16.msra.mxu0 %v217_v25 }
  0x49   :  { %193 = vmatmul.mubr.f32.vlgmr.msra.gmra.mrb[0].mxu0 %v38_v26 }
 0x11c   :  { %v121_v27 = vpop.f32.mrb[0].mxu0 }
 0x11d   :  { %227 = vtanh.f32 %v121_v27  ;;  %v194_v28 = vpop.f32.mrb[1].mxu0 }
 0x127   :  { %v228_v29 = vpop.eup %227 }
 0x128   :  { %126 = vst [vmem:[#allocation7] sm:$0xff] %v228_v29 }
 0x129   :  { %284 = shalt.err (!%p281_p6)
}
 0x12a   :  { %s285_s10 = scalar_lea.hbm %s369_s2, 128 }
 0x12b   :  { %p286_p7 = scmp.ne.s32.totalorder %s369_s2, %s285_s10  ;;  %p289_p8 = scmp.lt.u32.totalorder %s285_s10, %s369_s2 }
 0x12d   :  { %p291_p9 = pnand %p289_p8, %p286_p7 }
 0x12f   :  { %294 = shalt.err (!%p291_p9)
}
 0x130   :  { %136 = dma.vmem_to_hbm [thread:$0]  %s134_s6, 128, %s369_s2, [#allocation4]  }
 0x131   :  { %299 = dma.done.wait [#allocation4], 128  }
 0x132   :  { %300 = vsyncadd [#allocation4], 4294967168 }
 0x133   :  { %140 = vsyncpa [#allocation3], 1 }
 0x134   :  { %141 = vsyncpa [#allocation6], 1 }
 0x135   :  { %142 = vsyncpa [#allocation4], 1 }

</bundles_post_ra>
